<compile_context>
chip_gen: v7x
topology: tpu7x:2x2x1
jax: 0.10.0
libtpu: 0.0.40
codegen_flags: <defaults>
</compile_context>

<pallas_src>
import math
from functools import partial

import jax
import jax.numpy as jnp
from jax.experimental import pallas as pl
from jax.experimental.pallas import tpu as pltpu


# ------------------------------ kernel helpers ------------------------------

def _layernorm(x, gamma, beta, eps=1e-5):
    # PyTorch nn.LayerNorm: biased variance over the last axis, eps=1e-5.
    mean = jnp.mean(x, axis=-1, keepdims=True)
    var = jnp.mean((x - mean) ** 2, axis=-1, keepdims=True)
    return (x - mean) * jax.lax.rsqrt(var + eps) * gamma + beta


# --------------------------- fused EncoderLayer -----------------------------

def encoder_layer_kernel(x_ref,
                         wqkv_ref, bqkv_ref, wo_ref, bo_ref, ga_ref, ba_ref,
                         w1_ref, b1_ref, w2_ref, b2_ref, gf_ref, bf_ref,
                         out_ref, attn_ref,
                         *, n_heads, d_k, d_v):
    x = x_ref[...]                                   # (S, D) f32 — residual path
    mm_dtype = wqkv_ref.dtype                        # matmul operand dtype (bf16)

    # --- Fused Q|K|V projection: one MXU matmul + one bias add.
    qkv = jnp.dot(x.astype(mm_dtype), wqkv_ref[...],
                  preferred_element_type=jnp.float32) + bqkv_ref[...]
    qkv_mm = qkv.astype(mm_dtype)                    # single cast for score/ctx matmuls

    q_off = 0
    k_off = n_heads * d_k
    v_off = 2 * n_heads * d_k

    attn_cols = []
    ctx_cols = []
    # Static unroll over heads: every op is a plain 2-D tile op.
    # Score scale (1/sqrt(64), torch quirk) is pre-folded into wq/bq.
    for h in range(n_heads):
        qh = qkv_mm[:, q_off + h * d_k: q_off + (h + 1) * d_k]   # (S, d_k)
        kh = qkv_mm[:, k_off + h * d_k: k_off + (h + 1) * d_k]   # (S, d_k)
        vh = qkv_mm[:, v_off + h * d_v: v_off + (h + 1) * d_v]   # (S, d_v)
        # q @ k^T expressed as dot_general contracting the last dims (no
        # materialized transpose).
        s = jax.lax.dot_general(qh, kh, (((1,), (1,)), ((), ())),
                                preferred_element_type=jnp.float32)  # (S, S)
        m = jnp.max(s, axis=-1, keepdims=True)
        e = jnp.exp(s - m)
        p = e / jnp.sum(e, axis=-1, keepdims=True)   # exact softmax: rows sum to 1
        attn_cols.append(p)
        ctx_cols.append(jnp.dot(p.astype(mm_dtype), vh,
                                preferred_element_type=jnp.float32))  # (S, d_v)

    # Lane-dense single store: heads concatenated along the last (lane) axis.
    attn_ref[...] = jnp.concatenate(attn_cols, axis=-1).astype(attn_ref.dtype)

    # ctx is already in (seq, head*d_v) layout — matches torch's
    # transpose(1,2).contiguous().view(...).
    ctx = jnp.concatenate(ctx_cols, axis=-1)         # (S, H*d_v) f32
    a = jnp.dot(ctx.astype(mm_dtype), wo_ref[...],
                preferred_element_type=jnp.float32) + bo_ref[...]
    a = _layernorm(a + x, ga_ref[...], ba_ref[...])  # (S, D) f32, attention output

    # --- PoswiseFeedForwardNet (Conv1d k=1 == pointwise Linear), residual = a
    hdn = jnp.dot(a.astype(mm_dtype), w1_ref[...],
                  preferred_element_type=jnp.float32) + b1_ref[...]
    hdn = jnp.maximum(hdn, 0.0)                      # ReLU
    y = jnp.dot(hdn.astype(mm_dtype), w2_ref[...],
                preferred_element_type=jnp.float32) + b2_ref[...]
    out_ref[...] = _layernorm(y + a, gf_ref[...], bf_ref[...]).astype(out_ref.dtype)


def pack_params(p, *, matmul_dtype=jnp.bfloat16):
    """One-time weight transform (NOT a per-call pre-scale):
       * fold the 1/sqrt(64) score scale into wq / bq,
       * fuse Q|K|V weights/biases into single (D, 3*H*d_k) / (1, 3*H*d_k) tensors,
       * cast matmul weights to bf16 (MXU-native on v6e/v7x; fine on v5e);
         biases / LayerNorm params stay f32."""
    scale = 1.0 / math.sqrt(64.0)   # ScaledDotProductAttention default d_k=64 quirk
    w_qkv = jnp.concatenate([p["wq"] * scale, p["wk"], p["wv"]], axis=1)
    b_qkv = jnp.concatenate([p["bq"] * scale, p["bk"], p["bv"]], axis=1)
    return {
        "w_qkv": w_qkv.astype(matmul_dtype),
        "b_qkv": b_qkv.astype(jnp.float32),
        "wo": p["wo"].astype(matmul_dtype), "bo": p["bo"].astype(jnp.float32),
        "ga": p["ga"].astype(jnp.float32), "ba": p["ba"].astype(jnp.float32),
        "w1": p["w1"].astype(matmul_dtype), "b1": p["b1"].astype(jnp.float32),
        "w2": p["w2"].astype(matmul_dtype), "b2": p["b2"].astype(jnp.float32),
        "gf": p["gf"].astype(jnp.float32), "bf": p["bf"].astype(jnp.float32),
    }


def encoder_layer(x, packed, *, n_heads, d_k, d_v):
    """x: (B, S, D) f32. packed: output of pack_params.
    Returns (enc_outputs (B,S,D), attn (B,H,S,S))."""
    B, S, D = x.shape
    weights = (packed["w_qkv"], packed["b_qkv"], packed["wo"], packed["bo"],
               packed["ga"], packed["ba"], packed["w1"], packed["b1"],
               packed["w2"], packed["b2"], packed["gf"], packed["bf"])

    def full_spec(arr):
        nd = arr.ndim
        # Whole array resident in VMEM; constant block index => fetched once.
        return pl.BlockSpec(arr.shape, lambda b, _nd=nd: (0,) * _nd)

    kernel = partial(encoder_layer_kernel, n_heads=n_heads, d_k=d_k, d_v=d_v)

    out, attn2 = pl.pallas_call(
        kernel,
        out_shape=(jax.ShapeDtypeStruct((B, S, D), x.dtype),
                   jax.ShapeDtypeStruct((B, S, n_heads * S), jnp.float32)),
        grid_spec=pltpu.PrefetchScalarGridSpec(
            num_scalar_prefetch=0,
            grid=(B,),
            in_specs=[pl.BlockSpec((None, S, D), lambda b: (b, 0, 0))]
                     + [full_spec(w) for w in weights],
            out_specs=(pl.BlockSpec((None, S, D), lambda b: (b, 0, 0)),
                       pl.BlockSpec((None, S, n_heads * S), lambda b: (b, 0, 0))),
        ),
        compiler_params=pltpu.CompilerParams(
            dimension_semantics=("parallel",)),   # shards batch across TCs on v7x
    )(x, *weights)

    # Lane-dense (B, S, H*S) store -> reference (B, H, S, S) layout (wrapper-side,
    # outside the kernel's store path).
    attn = attn2.reshape(B, S, n_heads, S).transpose(0, 2, 1, 3)
    return out, attn


# ------------------------------ pure-JAX reference ---------------------------

def encoder_layer_ref(x, p, *, n_heads, d_k, d_v):
    B, S, D = x.shape

    def ln(v, g, b, eps=1e-5):
        mu = jnp.mean(v, axis=-1, keepdims=True)
        var = jnp.mean((v - mu) ** 2, axis=-1, keepdims=True)
        return (v - mu) / jnp.sqrt(var + eps) * g + b

    q = (x @ p["wq"] + p["bq"]).reshape(B, S, n_heads, d_k).transpose(0, 2, 1, 3)
    k = (x @ p["wk"] + p["bk"]).reshape(B, S, n_heads, d_k).transpose(0, 2, 1, 3)
    v = (x @ p["wv"] + p["bv"]).reshape(B, S, n_heads, d_v).transpose(0, 2, 1, 3)
    scores = jnp.einsum('bhqd,bhkd->bhqk', q, k) / jnp.sqrt(64.0)
    attn = jax.nn.softmax(scores, axis=-1)
    ctx = jnp.einsum('bhqk,bhkd->bhqd', attn, v)
    ctx = ctx.transpose(0, 2, 1, 3).reshape(B, S, n_heads * d_v)
    a = ln(ctx @ p["wo"] + p["bo"] + x, p["ga"], p["ba"])
    h = jax.nn.relu(a @ p["w1"] + p["b1"])
    y = h @ p["w2"] + p["b2"]
    return ln(y + a, p["gf"], p["bf"]), attn


# ------------------------------ parameter setup ------------------------------

def init_params(key, *, dim, n_heads, d_k, d_v, d_ff):
    ks = jax.random.split(key, 12)
    s = 0.05
    return {
        "wq": s * jax.random.normal(ks[0], (dim, n_heads * d_k), jnp.float32),
        "bq": s * jax.random.normal(ks[1], (1, n_heads * d_k), jnp.float32),
        "wk": s * jax.random.normal(ks[2], (dim, n_heads * d_k), jnp.float32),
        "bk": s * jax.random.normal(ks[3], (1, n_heads * d_k), jnp.float32),
        "wv": s * jax.random.normal(ks[4], (dim, n_heads * d_v), jnp.float32),
        "bv": s * jax.random.normal(ks[5], (1, n_heads * d_v), jnp.float32),
        "wo": s * jax.random.normal(ks[6], (n_heads * d_v, dim), jnp.float32),
        "bo": s * jax.random.normal(ks[7], (1, dim), jnp.float32),
        "ga": jnp.ones((1, dim), jnp.float32),     # LayerNorm after attention
        "ba": jnp.zeros((1, dim), jnp.float32),
        # Conv1d(kernel_size=1) == pointwise linear: weight stored as [D_in, D_out]
        "w1": s * jax.random.normal(ks[8], (dim, d_ff), jnp.float32),
        "b1": s * jax.random.normal(ks[9], (1, d_ff), jnp.float32),
        "w2": s * jax.random.normal(ks[10], (d_ff, dim), jnp.float32),
        "b2": s * jax.random.normal(ks[11], (1, dim), jnp.float32),
        "gf": jnp.ones((1, dim), jnp.float32),     # LayerNorm after FFN
        "bf": jnp.zeros((1, dim), jnp.float32),
    }


# ------------------------------------ main -----------------------------------

if __name__ == "__main__":
    # Shapes consistent with the module: dim=32, n_heads=4, d_k=d_v=16, d_ff=64;
    # batch=2, seq=8.
    B, S, DIM, N_HEADS, D_K, D_V, D_FF = 2, 8, 32, 4, 16, 16, 64

    root = jax.random.PRNGKey(0)
    kx, kp = jax.random.split(root)
    enc_inputs = jax.random.normal(kx, (B, S, DIM), jnp.float32)
    params = init_params(kp, dim=DIM, n_heads=N_HEADS, d_k=D_K, d_v=D_V, d_ff=D_FF)
    packed = pack_params(params, matmul_dtype=jnp.bfloat16)

    enc_out, attn = encoder_layer(enc_inputs, packed,
                                  n_heads=N_HEADS, d_k=D_K, d_v=D_V)
    enc_out = jax.block_until_ready(enc_out)
    attn = jax.block_until_ready(attn)

    ref_out, ref_attn = encoder_layer_ref(enc_inputs, params,
                                          n_heads=N_HEADS, d_k=D_K, d_v=D_V)

    assert enc_out.shape == (B, S, DIM)
    assert attn.shape == (B, N_HEADS, S, S)
    assert bool(jnp.all(jnp.isfinite(enc_out)))
    # bf16 matmul operands (f32 accumulation); softmax/LayerNorm exact in f32.
    assert bool(jnp.allclose(enc_out, ref_out, atol=2e-2, rtol=2e-2))
    assert bool(jnp.allclose(attn, ref_attn, atol=2e-2, rtol=2e-2))
    # Exact softmax normalization on the returned attention maps.
    assert bool(jnp.allclose(jnp.sum(attn, axis=-1), 1.0, atol=1e-3))

    print("KERNEL_OK")
</pallas_src>

<mosaic_0001>
module attributes {stable_mosaic.version = 11 : i64} {
  func.func @encoder_layer_kernel(%arg0: i32, %arg1: memref<1x8x32xf32, #tpu.memory_space<vmem>>, %arg2: memref<32x192xbf16, #tpu.memory_space<vmem>>, %arg3: memref<1x192xf32, #tpu.memory_space<vmem>>, %arg4: memref<64x32xbf16, #tpu.memory_space<vmem>>, %arg5: memref<1x32xf32, #tpu.memory_space<vmem>>, %arg6: memref<1x32xf32, #tpu.memory_space<vmem>>, %arg7: memref<1x32xf32, #tpu.memory_space<vmem>>, %arg8: memref<32x64xbf16, #tpu.memory_space<vmem>>, %arg9: memref<1x64xf32, #tpu.memory_space<vmem>>, %arg10: memref<64x32xbf16, #tpu.memory_space<vmem>>, %arg11: memref<1x32xf32, #tpu.memory_space<vmem>>, %arg12: memref<1x32xf32, #tpu.memory_space<vmem>>, %arg13: memref<1x32xf32, #tpu.memory_space<vmem>>, %arg14: memref<1x8x32xf32, #tpu.memory_space<vmem>>, %arg15: memref<1x8x32xf32, #tpu.memory_space<vmem>>) attributes {dimension_semantics = [#tpu.dimension_semantics<parallel>], iteration_bounds = array<i64: 2>, scalar_prefetch = 0 : i64, scratch_operands = 0 : i64, tpu.core_type = #tpu.core_type<tc>, window_params = [{transform_indices = @transform_0, window_bounds = array<i64: 1, 8, 32>}, {pipeline_mode = #tpu.pipeline_mode<synchronous>, transform_indices = @transform_1, window_bounds = array<i64: 32, 192>}, {pipeline_mode = #tpu.pipeline_mode<synchronous>, transform_indices = @transform_2, window_bounds = array<i64: 1, 192>}, {pipeline_mode = #tpu.pipeline_mode<synchronous>, transform_indices = @transform_3, window_bounds = array<i64: 64, 32>}, {pipeline_mode = #tpu.pipeline_mode<synchronous>, transform_indices = @transform_4, window_bounds = array<i64: 1, 32>}, {pipeline_mode = #tpu.pipeline_mode<synchronous>, transform_indices = @transform_5, window_bounds = array<i64: 1, 32>}, {pipeline_mode = #tpu.pipeline_mode<synchronous>, transform_indices = @transform_6, window_bounds = array<i64: 1, 32>}, {pipeline_mode = #tpu.pipeline_mode<synchronous>, transform_indices = @transform_7, window_bounds = array<i64: 32, 64>}, {pipeline_mode = #tpu.pipeline_mode<synchronous>, transform_indices = @transform_8, window_bounds = array<i64: 1, 64>}, {pipeline_mode = #tpu.pipeline_mode<synchronous>, transform_indices = @transform_9, window_bounds = array<i64: 64, 32>}, {pipeline_mode = #tpu.pipeline_mode<synchronous>, transform_indices = @transform_10, window_bounds = array<i64: 1, 32>}, {pipeline_mode = #tpu.pipeline_mode<synchronous>, transform_indices = @transform_11, window_bounds = array<i64: 1, 32>}, {pipeline_mode = #tpu.pipeline_mode<synchronous>, transform_indices = @transform_12, window_bounds = array<i64: 1, 32>}, {transform_indices = @transform_13, window_bounds = array<i64: 1, 8, 32>}, {transform_indices = @transform_14, window_bounds = array<i64: 1, 8, 32>}]} {
    %c0 = arith.constant 0 : index
    %c0_0 = arith.constant 0 : index
    %c0_1 = arith.constant 0 : index
    %0 = vector.load %arg1[%c0, %c0_0, %c0_1] : memref<1x8x32xf32, #tpu.memory_space<vmem>>, vector<1x8x32xf32>
    %1 = vector.shape_cast %0 : vector<1x8x32xf32> to vector<8x32xf32>
    %2 = arith.truncf %1 : vector<8x32xf32> to vector<8x32xbf16>
    %c0_2 = arith.constant 0 : index
    %c0_3 = arith.constant 0 : index
    %3 = vector.load %arg2[%c0_2, %c0_3] : memref<32x192xbf16, #tpu.memory_space<vmem>>, vector<32x192xbf16>
    %cst = arith.constant dense<0.000000e+00> : vector<8x192xf32>
    %4 = tpu.matmul %2, %3, %cst {dimension_numbers = #tpu.dot_dimension_numbers<[1], [0], [0], [1], [0, 0, 1, 1], [], []>} : vector<8x32xbf16>, vector<32x192xbf16>, vector<8x192xf32> -> vector<8x192xf32>
    %c0_4 = arith.constant 0 : index
    %c0_5 = arith.constant 0 : index
    %5 = vector.load %arg3[%c0_4, %c0_5] : memref<1x192xf32, #tpu.memory_space<vmem>>, vector<1x192xf32>
    %6 = vector.broadcast %5 : vector<1x192xf32> to vector<8x192xf32>
    %7 = arith.addf %4, %6 : vector<8x192xf32>
    %8 = arith.truncf %7 : vector<8x192xf32> to vector<8x192xbf16>
    %9 = vector.extract_strided_slice %8 {offsets = [0, 0], sizes = [8, 16], strides = [1, 1]} : vector<8x192xbf16> to vector<8x16xbf16>
    %10 = vector.extract_strided_slice %8 {offsets = [0, 64], sizes = [8, 16], strides = [1, 1]} : vector<8x192xbf16> to vector<8x16xbf16>
    %11 = vector.extract_strided_slice %8 {offsets = [0, 128], sizes = [8, 16], strides = [1, 1]} : vector<8x192xbf16> to vector<8x16xbf16>
    %cst_6 = arith.constant dense<0.000000e+00> : vector<8x8xf32>
    %12 = tpu.matmul %9, %10, %cst_6 {dimension_numbers = #tpu.dot_dimension_numbers<[1], [1], [0], [0], [0, 0, 1, 0], [], []>} : vector<8x16xbf16>, vector<8x16xbf16>, vector<8x8xf32> -> vector<8x8xf32>
    %cst_7 = arith.constant dense<0xFF800000> : vector<8xf32>
    %13 = vector.multi_reduction <maximumf>, %12, %cst_7 [1] : vector<8x8xf32> to vector<8xf32>
    %14 = vector.shape_cast %13 : vector<8xf32> to vector<8x1xf32>
    %15 = vector.broadcast %14 : vector<8x1xf32> to vector<8x8xf32>
    %16 = arith.subf %12, %15 : vector<8x8xf32>
    %17 = math.exp %16 : vector<8x8xf32>
    %cst_8 = arith.constant dense<0.000000e+00> : vector<8xf32>
    %18 = vector.multi_reduction <add>, %17, %cst_8 [1] : vector<8x8xf32> to vector<8xf32>
    %19 = vector.shape_cast %18 : vector<8xf32> to vector<8x1xf32>
    %20 = vector.broadcast %19 : vector<8x1xf32> to vector<8x8xf32>
    %21 = arith.divf %17, %20 : vector<8x8xf32>
    %22 = arith.truncf %21 : vector<8x8xf32> to vector<8x8xbf16>
    %cst_9 = arith.constant dense<0.000000e+00> : vector<8x16xf32>
    %23 = tpu.matmul %22, %11, %cst_9 {dimension_numbers = #tpu.dot_dimension_numbers<[1], [0], [0], [1], [0, 0, 1, 1], [], []>} : vector<8x8xbf16>, vector<8x16xbf16>, vector<8x16xf32> -> vector<8x16xf32>
    %24 = vector.extract_strided_slice %8 {offsets = [0, 16], sizes = [8, 16], strides = [1, 1]} : vector<8x192xbf16> to vector<8x16xbf16>
    %25 = vector.extract_strided_slice %8 {offsets = [0, 80], sizes = [8, 16], strides = [1, 1]} : vector<8x192xbf16> to vector<8x16xbf16>
    %26 = vector.extract_strided_slice %8 {offsets = [0, 144], sizes = [8, 16], strides = [1, 1]} : vector<8x192xbf16> to vector<8x16xbf16>
    %cst_10 = arith.constant dense<0.000000e+00> : vector<8x8xf32>
    %27 = tpu.matmul %24, %25, %cst_10 {dimension_numbers = #tpu.dot_dimension_numbers<[1], [1], [0], [0], [0, 0, 1, 0], [], []>} : vector<8x16xbf16>, vector<8x16xbf16>, vector<8x8xf32> -> vector<8x8xf32>
    %cst_11 = arith.constant dense<0xFF800000> : vector<8xf32>
    %28 = vector.multi_reduction <maximumf>, %27, %cst_11 [1] : vector<8x8xf32> to vector<8xf32>
    %29 = vector.shape_cast %28 : vector<8xf32> to vector<8x1xf32>
    %30 = vector.broadcast %29 : vector<8x1xf32> to vector<8x8xf32>
    %31 = arith.subf %27, %30 : vector<8x8xf32>
    %32 = math.exp %31 : vector<8x8xf32>
    %cst_12 = arith.constant dense<0.000000e+00> : vector<8xf32>
    %33 = vector.multi_reduction <add>, %32, %cst_12 [1] : vector<8x8xf32> to vector<8xf32>
    %34 = vector.shape_cast %33 : vector<8xf32> to vector<8x1xf32>
    %35 = vector.broadcast %34 : vector<8x1xf32> to vector<8x8xf32>
    %36 = arith.divf %32, %35 : vector<8x8xf32>
    %37 = arith.truncf %36 : vector<8x8xf32> to vector<8x8xbf16>
    %cst_13 = arith.constant dense<0.000000e+00> : vector<8x16xf32>
    %38 = tpu.matmul %37, %26, %cst_13 {dimension_numbers = #tpu.dot_dimension_numbers<[1], [0], [0], [1], [0, 0, 1, 1], [], []>} : vector<8x8xbf16>, vector<8x16xbf16>, vector<8x16xf32> -> vector<8x16xf32>
    %39 = vector.extract_strided_slice %8 {offsets = [0, 32], sizes = [8, 16], strides = [1, 1]} : vector<8x192xbf16> to vector<8x16xbf16>
    %40 = vector.extract_strided_slice %8 {offsets = [0, 96], sizes = [8, 16], strides = [1, 1]} : vector<8x192xbf16> to vector<8x16xbf16>
    %41 = vector.extract_strided_slice %8 {offsets = [0, 160], sizes = [8, 16], strides = [1, 1]} : vector<8x192xbf16> to vector<8x16xbf16>
    %cst_14 = arith.constant dense<0.000000e+00> : vector<8x8xf32>
    %42 = tpu.matmul %39, %40, %cst_14 {dimension_numbers = #tpu.dot_dimension_numbers<[1], [1], [0], [0], [0, 0, 1, 0], [], []>} : vector<8x16xbf16>, vector<8x16xbf16>, vector<8x8xf32> -> vector<8x8xf32>
    %cst_15 = arith.constant dense<0xFF800000> : vector<8xf32>
    %43 = vector.multi_reduction <maximumf>, %42, %cst_15 [1] : vector<8x8xf32> to vector<8xf32>
    %44 = vector.shape_cast %43 : vector<8xf32> to vector<8x1xf32>
    %45 = vector.broadcast %44 : vector<8x1xf32> to vector<8x8xf32>
    %46 = arith.subf %42, %45 : vector<8x8xf32>
    %47 = math.exp %46 : vector<8x8xf32>
    %cst_16 = arith.constant dense<0.000000e+00> : vector<8xf32>
    %48 = vector.multi_reduction <add>, %47, %cst_16 [1] : vector<8x8xf32> to vector<8xf32>
    %49 = vector.shape_cast %48 : vector<8xf32> to vector<8x1xf32>
    %50 = vector.broadcast %49 : vector<8x1xf32> to vector<8x8xf32>
    %51 = arith.divf %47, %50 : vector<8x8xf32>
    %52 = arith.truncf %51 : vector<8x8xf32> to vector<8x8xbf16>
    %cst_17 = arith.constant dense<0.000000e+00> : vector<8x16xf32>
    %53 = tpu.matmul %52, %41, %cst_17 {dimension_numbers = #tpu.dot_dimension_numbers<[1], [0], [0], [1], [0, 0, 1, 1], [], []>} : vector<8x8xbf16>, vector<8x16xbf16>, vector<8x16xf32> -> vector<8x16xf32>
    %54 = vector.extract_strided_slice %8 {offsets = [0, 48], sizes = [8, 16], strides = [1, 1]} : vector<8x192xbf16> to vector<8x16xbf16>
    %55 = vector.extract_strided_slice %8 {offsets = [0, 112], sizes = [8, 16], strides = [1, 1]} : vector<8x192xbf16> to vector<8x16xbf16>
    %56 = vector.extract_strided_slice %8 {offsets = [0, 176], sizes = [8, 16], strides = [1, 1]} : vector<8x192xbf16> to vector<8x16xbf16>
    %cst_18 = arith.constant dense<0.000000e+00> : vector<8x8xf32>
    %57 = tpu.matmul %54, %55, %cst_18 {dimension_numbers = #tpu.dot_dimension_numbers<[1], [1], [0], [0], [0, 0, 1, 0], [], []>} : vector<8x16xbf16>, vector<8x16xbf16>, vector<8x8xf32> -> vector<8x8xf32>
    %cst_19 = arith.constant dense<0xFF800000> : vector<8xf32>
    %58 = vector.multi_reduction <maximumf>, %57, %cst_19 [1] : vector<8x8xf32> to vector<8xf32>
    %59 = vector.shape_cast %58 : vector<8xf32> to vector<8x1xf32>
    %60 = vector.broadcast %59 : vector<8x1xf32> to vector<8x8xf32>
    %61 = arith.subf %57, %60 : vector<8x8xf32>
    %62 = math.exp %61 : vector<8x8xf32>
    %cst_20 = arith.constant dense<0.000000e+00> : vector<8xf32>
    %63 = vector.multi_reduction <add>, %62, %cst_20 [1] : vector<8x8xf32> to vector<8xf32>
    %64 = vector.shape_cast %63 : vector<8xf32> to vector<8x1xf32>
    %65 = vector.broadcast %64 : vector<8x1xf32> to vector<8x8xf32>
    %66 = arith.divf %62, %65 : vector<8x8xf32>
    %67 = arith.truncf %66 : vector<8x8xf32> to vector<8x8xbf16>
    %cst_21 = arith.constant dense<0.000000e+00> : vector<8x16xf32>
    %68 = tpu.matmul %67, %56, %cst_21 {dimension_numbers = #tpu.dot_dimension_numbers<[1], [0], [0], [1], [0, 0, 1, 1], [], []>} : vector<8x8xbf16>, vector<8x16xbf16>, vector<8x16xf32> -> vector<8x16xf32>
    %69 = tpu.concatenate %21, %36, %51, %66 in 1 : vector<8x8xf32>, vector<8x8xf32>, vector<8x8xf32>, vector<8x8xf32> -> vector<8x32xf32>
    %c0_22 = arith.constant 0 : index
    %c0_23 = arith.constant 0 : index
    %c0_24 = arith.constant 0 : index
    %70 = vector.load %arg15[%c0_22, %c0_23, %c0_24] : memref<1x8x32xf32, #tpu.memory_space<vmem>>, vector<1x8x32xf32>
    %71 = vector.shape_cast %70 : vector<1x8x32xf32> to vector<8x32xf32>
    %72 = vector.shape_cast %69 : vector<8x32xf32> to vector<1x8x32xf32>
    tpu.vector_store %arg15[%c0_22, %c0_23, %c0_24], %72 {strides = array<i32>} : memref<1x8x32xf32, #tpu.memory_space<vmem>>, vector<1x8x32xf32>,
    %73 = tpu.concatenate %23, %38, %53, %68 in 1 : vector<8x16xf32>, vector<8x16xf32>, vector<8x16xf32>, vector<8x16xf32> -> vector<8x64xf32>
    %74 = arith.truncf %73 : vector<8x64xf32> to vector<8x64xbf16>
    %c0_25 = arith.constant 0 : index
    %c0_26 = arith.constant 0 : index
    %75 = vector.load %arg4[%c0_25, %c0_26] : memref<64x32xbf16, #tpu.memory_space<vmem>>, vector<64x32xbf16>
    %cst_27 = arith.constant dense<0.000000e+00> : vector<8x32xf32>
    %76 = tpu.matmul %74, %75, %cst_27 {dimension_numbers = #tpu.dot_dimension_numbers<[1], [0], [0], [1], [0, 0, 1, 1], [], []>} : vector<8x64xbf16>, vector<64x32xbf16>, vector<8x32xf32> -> vector<8x32xf32>
    %c0_28 = arith.constant 0 : index
    %c0_29 = arith.constant 0 : index
    %77 = vector.load %arg5[%c0_28, %c0_29] : memref<1x32xf32, #tpu.memory_space<vmem>>, vector<1x32xf32>
    %78 = vector.broadcast %77 : vector<1x32xf32> to vector<8x32xf32>
    %79 = arith.addf %76, %78 : vector<8x32xf32>
    %80 = arith.addf %79, %1 : vector<8x32xf32>
    %c0_30 = arith.constant 0 : index
    %c0_31 = arith.constant 0 : index
    %81 = vector.load %arg6[%c0_30, %c0_31] : memref<1x32xf32, #tpu.memory_space<vmem>>, vector<1x32xf32>
    %c0_32 = arith.constant 0 : index
    %c0_33 = arith.constant 0 : index
    %82 = vector.load %arg7[%c0_32, %c0_33] : memref<1x32xf32, #tpu.memory_space<vmem>>, vector<1x32xf32>
    %cst_34 = arith.constant dense<0.000000e+00> : vector<8xf32>
    %83 = vector.multi_reduction <add>, %80, %cst_34 [1] : vector<8x32xf32> to vector<8xf32>
    %84 = vector.shape_cast %83 : vector<8xf32> to vector<8x1xf32>
    %cst_35 = arith.constant 3.200000e+01 : f32
    %85 = vector.broadcast %cst_35 : f32 to vector<8x1xf32>
    %86 = arith.divf %84, %85 : vector<8x1xf32>
    %87 = vector.broadcast %86 : vector<8x1xf32> to vector<8x32xf32>
    %88 = arith.subf %80, %87 : vector<8x32xf32>
    %89 = arith.mulf %88, %88 : vector<8x32xf32>
    %cst_36 = arith.constant dense<0.000000e+00> : vector<8xf32>
    %90 = vector.multi_reduction <add>, %89, %cst_36 [1] : vector<8x32xf32> to vector<8xf32>
    %91 = vector.shape_cast %90 : vector<8xf32> to vector<8x1xf32>
    %cst_37 = arith.constant 3.200000e+01 : f32
    %92 = vector.broadcast %cst_37 : f32 to vector<8x1xf32>
    %93 = arith.divf %91, %92 : vector<8x1xf32>
    %94 = vector.broadcast %86 : vector<8x1xf32> to vector<8x32xf32>
    %95 = arith.subf %80, %94 : vector<8x32xf32>
    %cst_38 = arith.constant 9.99999974E-6 : f32
    %96 = vector.broadcast %cst_38 : f32 to vector<8x1xf32>
    %97 = arith.addf %93, %96 : vector<8x1xf32>
    %98 = math.rsqrt %97 : vector<8x1xf32>
    %99 = vector.broadcast %98 : vector<8x1xf32> to vector<8x32xf32>
    %100 = arith.mulf %95, %99 : vector<8x32xf32>
    %101 = vector.broadcast %81 : vector<1x32xf32> to vector<8x32xf32>
    %102 = arith.mulf %100, %101 : vector<8x32xf32>
    %103 = vector.broadcast %82 : vector<1x32xf32> to vector<8x32xf32>
    %104 = arith.addf %102, %103 : vector<8x32xf32>
    %105 = arith.truncf %104 : vector<8x32xf32> to vector<8x32xbf16>
    %c0_39 = arith.constant 0 : index
    %c0_40 = arith.constant 0 : index
    %106 = vector.load %arg8[%c0_39, %c0_40] : memref<32x64xbf16, #tpu.memory_space<vmem>>, vector<32x64xbf16>
    %cst_41 = arith.constant dense<0.000000e+00> : vector<8x64xf32>
    %107 = tpu.matmul %105, %106, %cst_41 {dimension_numbers = #tpu.dot_dimension_numbers<[1], [0], [0], [1], [0, 0, 1, 1], [], []>} : vector<8x32xbf16>, vector<32x64xbf16>, vector<8x64xf32> -> vector<8x64xf32>
    %c0_42 = arith.constant 0 : index
    %c0_43 = arith.constant 0 : index
    %108 = vector.load %arg9[%c0_42, %c0_43] : memref<1x64xf32, #tpu.memory_space<vmem>>, vector<1x64xf32>
    %109 = vector.broadcast %108 : vector<1x64xf32> to vector<8x64xf32>
    %110 = arith.addf %107, %109 : vector<8x64xf32>
    %cst_44 = arith.constant 0.000000e+00 : f32
    %111 = vector.broadcast %cst_44 : f32 to vector<8x64xf32>
    %112 = arith.maximumf %110, %111 : vector<8x64xf32>
    %113 = arith.truncf %112 : vector<8x64xf32> to vector<8x64xbf16>
    %c0_45 = arith.constant 0 : index
    %c0_46 = arith.constant 0 : index
    %114 = vector.load %arg10[%c0_45, %c0_46] : memref<64x32xbf16, #tpu.memory_space<vmem>>, vector<64x32xbf16>
    %cst_47 = arith.constant dense<0.000000e+00> : vector<8x32xf32>
    %115 = tpu.matmul %113, %114, %cst_47 {dimension_numbers = #tpu.dot_dimension_numbers<[1], [0], [0], [1], [0, 0, 1, 1], [], []>} : vector<8x64xbf16>, vector<64x32xbf16>, vector<8x32xf32> -> vector<8x32xf32>
    %c0_48 = arith.constant 0 : index
    %c0_49 = arith.constant 0 : index
    %116 = vector.load %arg11[%c0_48, %c0_49] : memref<1x32xf32, #tpu.memory_space<vmem>>, vector<1x32xf32>
    %117 = vector.broadcast %116 : vector<1x32xf32> to vector<8x32xf32>
    %118 = arith.addf %115, %117 : vector<8x32xf32>
    %119 = arith.addf %118, %104 : vector<8x32xf32>
    %c0_50 = arith.constant 0 : index
    %c0_51 = arith.constant 0 : index
    %120 = vector.load %arg12[%c0_50, %c0_51] : memref<1x32xf32, #tpu.memory_space<vmem>>, vector<1x32xf32>
    %c0_52 = arith.constant 0 : index
    %c0_53 = arith.constant 0 : index
    %121 = vector.load %arg13[%c0_52, %c0_53] : memref<1x32xf32, #tpu.memory_space<vmem>>, vector<1x32xf32>
    %cst_54 = arith.constant dense<0.000000e+00> : vector<8xf32>
    %122 = vector.multi_reduction <add>, %119, %cst_54 [1] : vector<8x32xf32> to vector<8xf32>
    %123 = vector.shape_cast %122 : vector<8xf32> to vector<8x1xf32>
    %cst_55 = arith.constant 3.200000e+01 : f32
    %124 = vector.broadcast %cst_55 : f32 to vector<8x1xf32>
    %125 = arith.divf %123, %124 : vector<8x1xf32>
    %126 = vector.broadcast %125 : vector<8x1xf32> to vector<8x32xf32>
    %127 = arith.subf %119, %126 : vector<8x32xf32>
    %128 = arith.mulf %127, %127 : vector<8x32xf32>
    %cst_56 = arith.constant dense<0.000000e+00> : vector<8xf32>
    %129 = vector.multi_reduction <add>, %128, %cst_56 [1] : vector<8x32xf32> to vector<8xf32>
    %130 = vector.shape_cast %129 : vector<8xf32> to vector<8x1xf32>
    %cst_57 = arith.constant 3.200000e+01 : f32
    %131 = vector.broadcast %cst_57 : f32 to vector<8x1xf32>
    %132 = arith.divf %130, %131 : vector<8x1xf32>
    %133 = vector.broadcast %125 : vector<8x1xf32> to vector<8x32xf32>
    %134 = arith.subf %119, %133 : vector<8x32xf32>
    %cst_58 = arith.constant 9.99999974E-6 : f32
    %135 = vector.broadcast %cst_58 : f32 to vector<8x1xf32>
    %136 = arith.addf %132, %135 : vector<8x1xf32>
    %137 = math.rsqrt %136 : vector<8x1xf32>
    %138 = vector.broadcast %137 : vector<8x1xf32> to vector<8x32xf32>
    %139 = arith.mulf %134, %138 : vector<8x32xf32>
    %140 = vector.broadcast %120 : vector<1x32xf32> to vector<8x32xf32>
    %141 = arith.mulf %139, %140 : vector<8x32xf32>
    %142 = vector.broadcast %121 : vector<1x32xf32> to vector<8x32xf32>
    %143 = arith.addf %141, %142 : vector<8x32xf32>
    %c0_59 = arith.constant 0 : index
    %c0_60 = arith.constant 0 : index
    %c0_61 = arith.constant 0 : index
    %144 = vector.load %arg14[%c0_59, %c0_60, %c0_61] : memref<1x8x32xf32, #tpu.memory_space<vmem>>, vector<1x8x32xf32>
    %145 = vector.shape_cast %144 : vector<1x8x32xf32> to vector<8x32xf32>
    %146 = vector.shape_cast %143 : vector<8x32xf32> to vector<1x8x32xf32>
    tpu.vector_store %arg14[%c0_59, %c0_60, %c0_61], %146 {strides = array<i32>} : memref<1x8x32xf32, #tpu.memory_space<vmem>>, vector<1x8x32xf32>,
    return
  }
  func.func @transform_0(%arg0: i32) -> (i32, i32, i32) {
    %c0_i32 = arith.constant 0 : i32
    %c0_i32_0 = arith.constant 0 : i32
    %c0_i32_1 = arith.constant 0 : i32
    return %arg0, %c0_i32, %c0_i32_0 : i32, i32, i32
  }
  func.func @transform_1(%arg0: i32) -> (i32, i32) {
    %c0_i32 = arith.constant 0 : i32
    %c0_i32_0 = arith.constant 0 : i32
    %c0_i32_1 = arith.constant 0 : i32
    return %c0_i32, %c0_i32_0 : i32, i32
  }
  func.func @transform_2(%arg0: i32) -> (i32, i32) {
    %c0_i32 = arith.constant 0 : i32
    %c0_i32_0 = arith.constant 0 : i32
    %c0_i32_1 = arith.constant 0 : i32
    return %c0_i32, %c0_i32_0 : i32, i32
  }
  func.func @transform_3(%arg0: i32) -> (i32, i32) {
    %c0_i32 = arith.constant 0 : i32
    %c0_i32_0 = arith.constant 0 : i32
    %c0_i32_1 = arith.constant 0 : i32
    return %c0_i32, %c0_i32_0 : i32, i32
  }
  func.func @transform_4(%arg0: i32) -> (i32, i32) {
    %c0_i32 = arith.constant 0 : i32
    %c0_i32_0 = arith.constant 0 : i32
    %c0_i32_1 = arith.constant 0 : i32
    return %c0_i32, %c0_i32_0 : i32, i32
  }
  func.func @transform_5(%arg0: i32) -> (i32, i32) {
    %c0_i32 = arith.constant 0 : i32
    %c0_i32_0 = arith.constant 0 : i32
    %c0_i32_1 = arith.constant 0 : i32
    return %c0_i32, %c0_i32_0 : i32, i32
  }
  func.func @transform_6(%arg0: i32) -> (i32, i32) {
    %c0_i32 = arith.constant 0 : i32
    %c0_i32_0 = arith.constant 0 : i32
    %c0_i32_1 = arith.constant 0 : i32
    return %c0_i32, %c0_i32_0 : i32, i32
  }
  func.func @transform_7(%arg0: i32) -> (i32, i32) {
    %c0_i32 = arith.constant 0 : i32
    %c0_i32_0 = arith.constant 0 : i32
    %c0_i32_1 = arith.constant 0 : i32
    return %c0_i32, %c0_i32_0 : i32, i32
  }
  func.func @transform_8(%arg0: i32) -> (i32, i32) {
    %c0_i32 = arith.constant 0 : i32
    %c0_i32_0 = arith.constant 0 : i32
    %c0_i32_1 = arith.constant 0 : i32
    return %c0_i32, %c0_i32_0 : i32, i32
  }
  func.func @transform_9(%arg0: i32) -> (i32, i32) {
    %c0_i32 = arith.constant 0 : i32
    %c0_i32_0 = arith.constant 0 : i32
    %c0_i32_1 = arith.constant 0 : i32
    return %c0_i32, %c0_i32_0 : i32, i32
  }
  func.func @transform_10(%arg0: i32) -> (i32, i32) {
    %c0_i32 = arith.constant 0 : i32
    %c0_i32_0 = arith.constant 0 : i32
    %c0_i32_1 = arith.constant 0 : i32
    return %c0_i32, %c0_i32_0 : i32, i32
  }
  func.func @transform_11(%arg0: i32) -> (i32, i32) {
    %c0_i32 = arith.constant 0 : i32
    %c0_i32_0 = arith.constant 0 : i32
    %c0_i32_1 = arith.constant 0 : i32
    return %c0_i32, %c0_i32_0 : i32, i32
  }
  func.func @transform_12(%arg0: i32) -> (i32, i32) {
    %c0_i32 = arith.constant 0 : i32
    %c0_i32_0 = arith.constant 0 : i32
    %c0_i32_1 = arith.constant 0 : i32
    return %c0_i32, %c0_i32_0 : i32, i32
  }
  func.func @transform_13(%arg0: i32) -> (i32, i32, i32) {
    %c0_i32 = arith.constant 0 : i32
    %c0_i32_0 = arith.constant 0 : i32
    %c0_i32_1 = arith.constant 0 : i32
    return %arg0, %c0_i32, %c0_i32_0 : i32, i32, i32
  }
  func.func @transform_14(%arg0: i32) -> (i32, i32, i32) {
    %c0_i32 = arith.constant 0 : i32
    %c0_i32_0 = arith.constant 0 : i32
    %c0_i32_1 = arith.constant 0 : i32
    return %arg0, %c0_i32, %c0_i32_0 : i32, i32, i32
  }
}

</mosaic_0001>

<bundles_post_ra>
// kernel: tpu_custom_call.1
= control target key start
LH: loop header
LB: loop body
LE: loop exit
PB: predicated region body
PF: predicated region fallthrough
CT: control target
= control target key end

     0   :  { %s2215_s0 = inlined_call_operand.vmem [shape: f32[2,8,32], index: 0, kind: input, shape index: {}]   ;;  %s2216_s1 = inlined_call_operand.vmem [shape: bf16[32,192], index: 1, kind: input, shape index: {}]   ;;  %s2217_s2 = inlined_call_operand.vmem [shape: f32[1,192], index: 2, kind: input, shape index: {}]   ;;  %s2218_s3 = inlined_call_operand.vmem [shape: bf16[64,32], index: 3, kind: input, shape index: {}]   ;;  %s2219_s4 = inlined_call_operand.vmem [shape: f32[1,32], index: 4, kind: input, shape index: {}]   ;;  %s2220_s5 = inlined_call_operand.vmem [shape: f32[1,32], index: 5, kind: input, shape index: {}]   ;;  %s2221_s6 = inlined_call_operand.vmem [shape: f32[1,32], index: 6, kind: input, shape index: {}]   ;;  %s2222_s7 = inlined_call_operand.vmem [shape: bf16[32,64], index: 7, kind: input, shape index: {}]   ;;  %s2223_s8 = inlined_call_operand.vmem [shape: f32[1,64], index: 8, kind: input, shape index: {}]   ;;  %s2224_s9 = inlined_call_operand.vmem [shape: bf16[64,32], index: 9, kind: input, shape index: {}]   ;;  %s2225_s10 = inlined_call_operand.vmem [shape: f32[1,32], index: 10, kind: input, shape index: {}]   ;;  %s2226_s11 = inlined_call_operand.vmem [shape: f32[1,32], index: 11, kind: input, shape index: {}]   ;;  %s2227_s12 = inlined_call_operand.vmem [shape: f32[1,32], index: 12, kind: input, shape index: {}]   ;;  %s2228_s13 = inlined_call_operand.hbm [shape: f32[2,8,32], index: 13, kind: output, shape index: {0}]   ;;  %s2229_s14 = inlined_call_operand.hbm [shape: f32[2,8,32], index: 14, kind: output, shape index: {1}]  }
   0x1   :  { %2235 = sst [smem:[#allocation11_spill]] %s2215_s0 }
   0x2   :  { %2236 = sst [smem:[#allocation12_spill]] %s2216_s1 }
   0x3   :  { %2237 = sst [smem:[#allocation13_spill]] %s2217_s2 }
   0x4   :  { %2238 = sst [smem:[#allocation14_spill]] %s2218_s3 }
   0x5   :  { %20 = vsyncpa [#allocation3], 0 }
   0x6   :  { %22 = vsyncpa [#allocation3 + $0x1], 0 }
   0x7   :  { %23 = vsyncpa [#allocation5], 0 }
   0x8   :  { %25 = vsyncpa [#allocation5 + $0x1], 0  ;;  %s1886_s29 = smov 0   ;;  %s1888_s30 = smov 0  }
   0x9   :  { %s1890_s15 = smov 0   ;;  %s1892_s16 = smov 0  }
   0xa LB: > { %2239 = sst [smem:[#allocation8_spill]] %s1791_s15  ;;  %s1907_s17 = sadd.s32 4294967295, %s1795_s16   ;;  %s1795_s16 = sphi %s1892_s16, %s2250_s16   ;;  %s1791_s15 = sphi %s1890_s15, %s2252_s15   ;;  %s1787_s30 = sphi %s1888_s30, %s2254_s30   ;;  %s1783_s29 = sphi %s1886_s29, %s2253_s29  }
   0xb   : > { %s1454_s18 = sadd.s32 4294967294, %s1795_s16   ;;  %s1911_s19 = sadd.s32 1, %s1795_s16  }
   0xc   : > { %2240 = sst [smem:[#allocation9_spill]] %s1911_s19  ;;  %s316_s20 = sadd.s32 1, %s1791_s15 }
   0xd   : > { %s313_s21 = ssub.s32 %s1795_s16, %s1911_s19  ;;  %p326_p0 = scmp.ne.s32.totalorder %s1791_s15, %s1787_s30 }
   0xe   : > { %p314_p1 = scmp.eq.s32.totalorder %s313_s21, 0  ;;  %p327_p2 = scmp.eq.s32.totalorder %s1907_s17, 1 }
   0xf   : > { %p332_p3 = scmp.ne.s32.totalorder %s1787_s30, %s1783_s29  ;;  %p333_p4 = scmp.eq.s32.totalorder %s1454_s18, 1 }
  0x10   : > { %s1922_s22 = scalar_select %p314_p1, %s1791_s15, %s316_s20  }
  0x11   : > { %p1924_p5 = por %p327_p2, %p326_p0  ;;  %p1928_p6 = por %p333_p4, %p332_p3 }
  0x12   : > { %2241 = sst [smem:[#allocation10_spill]] %s1922_s22  ;;  %p1457_p7 = scmp.ge.s32.totalorder %s1795_s16, 1 }
  0x13   : > { %p420_p8 = scmp.lt.s32.totalorder %s1795_s16, 3 }
  0x15   : > { %p421_p9 = pnand %p1457_p7, %p420_p8 }
  0x16   : > { %s2244_s1 = sld [smem:[#allocation12_spill]] (!%p421_p9)  ;;  %p470_p10 = scmp.lt.s32.totalorder (!%p421_p9), %s1907_s17, 1  ;;  %v1797_v2 = vmov (!%p421_p9), 0   ;;  %vm513_vm0 = vcmask (!%p421_p9), 261120   ;;  %v1798_v7 = vmov (!%p421_p9), 0.0   ;;  %v483_v8 = vlaneseq (!%p421_p9) }
  0x17   : > { %424 = sbr.rel (%p421_p9) target bundleno = 2596 (0xa24), region = 72  ;;  %549 = vmatprep.mubr.bf16.mxu1 (!%p421_p9), %v1797_v2  ;;  %s2245_s0 = sld [smem:[#allocation11_spill]] (!%p421_p9)  ;;  %1535 = vmatprep.subr.bf16.mxu0 (!%p421_p9), %v1798_v7  ;;  %vm1799_vm1 = vmmov (!%p421_p9), 0   ;;  %vm626_vm2 = vcmask (!%p421_p9), 1043456   ;;  %vm563_vm3 = vcmask (!%p421_p9), 130048   ;;  %vm610_vm4 = vcmask (!%p421_p9), 64512  }
  0x18   : > { %v484_v9 = vshrl.u32 (!%p421_p9), %v483_v8, 7  ;;  %s2246_s2 = sld [smem:[#allocation13_spill]] (!%p421_p9)  ;;  %1537 = vmatprep.mubr.msk.bf16.mxu0 (!%p421_p9), %vm1799_vm1, %v1798_v7  ;;  %s1800_s22 = smov (!%p421_p9), 112   ;;  %vm1032_vm5 = vcmask (!%p421_p9), 392192   ;;  %vm1074_vm6 = vcmask (!%p421_p9), 523264   ;;  %vm1015_vm7 = vcmask (!%p421_p9), 195584  }
  0x19   : > { %s1801_s28 = smov (!%p421_p9), 64   ;;  %s1802_s18 = smov (!%p421_p9), 32  }
  0x1a   : > { %v485_v10 = vsub.s32 (!%p421_p9), 0, %v484_v9  ;;  %v489_v12 = vsub.s32 (!%p421_p9), 1, %v484_v9  ;;  %s1803_s20 = smov (!%p421_p9), 48   ;;  %s1806_s26 = smov (!%p421_p9), 80  }
  0x1b   : > { %s2247_s3 = sld [smem:[#allocation14_spill]] (!%p421_p9)  ;;  %s1808_s19 = smov (!%p421_p9), 24  }
  0x1c   : > { %v1665_v0 = vld [vmem:[%s2244_s1 + $0x4] ss:$8 sps:$4 sm:$0xff] (!%p421_p9)   ;;  %v1667_v1 = vld [vmem:[%s2244_s1] ss:$8 sps:$4 sm:$0xff] (!%p421_p9)   ;;  %v1668_v3 = vld [vmem:[%s2244_s1 + $0x14] ss:$8 sps:$4 sm:$0xff] (!%p421_p9)  }
  0x1d   : > { %517 = vmatprep.subr.bf16.mxu1 (!%p421_p9), %v1665_v0  ;;  %v1670_v4 = vld [vmem:[%s2244_s1 + $0x10] ss:$8 sps:$4 sm:$0xff] (!%p421_p9)  }
  0x1e   : > { %s471_s21 = scalar_select %p470_p10, %s1907_s17, 1  ;;  %518 = vmatpush1.bf16.msra.mxu1 %v1667_v1  ;;  %v481_v11 = vld [vmem:[%s2246_s2] sm:$0x3] }
  0x1f   : > { %519 = vmatprep.subr.bf16.mxu1 %v1668_v3  ;;  %v486_v13 = vrot.slane %v481_v11, %v485_v10  ;;  %v490_v14 = vrot.slane %v481_v11, %v489_v12 }
  0x20   : > { %s1460_s25 = sshll.u32 %s471_s21, 3  ;;  %s1804_s21 = smov 16  }
  0x21   : > { %s473_s27 = scalar_lea.vmem %s2245_s0, %s1460_s25  ;;  %s1805_s25 = smov 96  }
  0x22   : > { %v1951_v5 = vld [vmem:[%s473_s27] sm:$0xff]  ;;  %520 = vmatpush1.bf16.msra.mxu1 %v1670_v4 }
  0x23   : > { %v476_v6 = vpack.c.bf16 %v1951_v5, %v1951_v5  ;;  %1529 = vmatprep.subr.bf16.mxu1 %v1798_v7 }
  0x25   : > { %1465 = vmatmul.mubr.msk.bf16.vlgmr.msra.gmra.mrb[0].mxu1 %vm513_vm0, %v476_v6 }
  0x26   : > { %1531 = vmatprep.mubr.msk.bf16.mxu1 %vm1799_vm1, %v1798_v7 }
  0xf8   : > { %v551_v15 = vpop.f32.mrb[0].mxu1 }
  0xf9   : > { %v552_v16 = vadd.f32 %v551_v15, %v486_v13  ;;  %v553_v17 = vpop.f32.mrb[1].mxu1 }
  0xfa   : > { %v554_v18 = vadd.f32 %v553_v17, %v490_v14  ;;  %v555_v19 = vpop.f32.mrb[2].mxu1 }
  0xfb   : > { %v558_v20 = vpack.c.bf16 %v552_v16, %v552_v16  ;;  %v556_v21 = vpop.f32.mrb[3].mxu1 }
  0xfc   : > { %v1965_v22 = vpack.c.bf16 %v554_v18, %v554_v18 }
  0xfd   : > { %670 = vrot.lane.b32.xlu1 %v558_v20, %s1800_s22  ;;  %561 = vrot.lane.b32.xlu0 %v558_v20, %s1801_s28 }
  0xfe   : > { %v628_v23 = vsel %vm626_vm2, %v1965_v22, 0 }
  0xff   : > { %1536 = vmatpush3.bf16.msra.mxu0 %v628_v23 }
 0x100   : > { %1547 = vmatprep.subr.bf16.mxu0 %v1798_v7 }
 0x101   : > { %783 = vrot.lane.b32.xlu1 %v558_v20, %s1802_s18  ;;  %672 = vrot.lane.b32.xlu0 %v558_v20, %s1803_s20 }
 0x105   : > { %893 = vrot.lane.b32.xlu1 %v558_v20, %s1804_s21  ;;  %781 = vrot.lane.b32.xlu0 %v558_v20, %s1805_s25 }
 0x109   : > { %891 = vrot.lane.b32.xlu0 %v558_v20, %s1806_s26 }
 0x16f   : > { %v562_v24 = vpop.permute.xlu0 %561  ;;  %v671_v27 = vpop.permute.xlu1 %670 }
 0x170   : > { %v568_v25 = vsel %vm563_vm3, %v562_v24, 0 }
 0x171   : > { %1530 = vmatpush3.bf16.xpose.msra.mxu1 %v568_v25 }
 0x172   : > { %1541 = vmatprep.subr.bf16.mxu1 %v1798_v7 }
 0x173   : > { %v673_v26 = vpop.permute.xlu0 %672  ;;  %v784_v29 = vpop.permute.xlu1 %783 }
 0x174   : > { %v678_v28 = vsel %vm563_vm3, %v673_v26, 0  ;;  %v789_v30 = vsel %vm563_vm3, %v784_v29, 0 }
 0x177   : > { %v894_v31 = vpop.permute.xlu1 %893  ;;  %v782_v32 = vpop.permute.xlu0 %781 }
 0x178   : > { %1532 = vmatmul.mubr.msk.bf16.vlgmr.msra.gmra.mrb[4].mxu1 %vm563_vm3, %v558_v20  ;;  %v899_v33 = vsel %vm563_vm3, %v894_v31, 0 }
 0x179   : > { %1542 = vmatpush3.bf16.xpose.msra.mxu1 %v678_v28  ;;  %1543 = vmatprep.mubr.msk.bf16.mxu1 %vm1799_vm1, %v1798_v7 }
 0x17a   : > { %1553 = vmatprep.subr.bf16.mxu1 %v1798_v7 }
 0x17b   : > { %v892_v34 = vpop.permute.xlu0 %891 }
 0x180   : > { %1544 = vmatmul.mubr.msk.bf16.vlgmr.msra.gmra.mrb[8].mxu1 %vm563_vm3, %v671_v27 }
 0x181   : > { %1554 = vmatpush3.bf16.xpose.msra.mxu1 %v789_v30  ;;  %1555 = vmatprep.mubr.msk.bf16.mxu1 %vm1799_vm1, %v1798_v7 }
 0x182   : > { %1565 = vmatprep.subr.bf16.mxu1 %v1798_v7 }
 0x188   : > { %1556 = vmatmul.mubr.msk.bf16.vlgmr.msra.gmra.mrb[12].mxu1 %vm563_vm3, %v782_v32 }
 0x189   : > { %1566 = vmatpush3.bf16.xpose.msra.mxu1 %v899_v33  ;;  %1567 = vmatprep.mubr.msk.bf16.mxu1 %vm1799_vm1, %v1798_v7 }
 0x18a   : > { %1577 = vmatprep.subr.bf16.mxu1 %v1798_v7 }
 0x190   : > { %1568 = vmatmul.mubr.msk.bf16.vlgmr.msra.gmra.mrb[16].mxu1 %vm563_vm3, %v892_v34 }
 0x191   : > { %1585 = vmatprep.mubr.msk.bf16.mxu1 %vm1799_vm1, %v1798_v7 }
 0x24b   : > { %v604_v35 = vpop.f32.mrb[4].mxu1 }
 0x24c   : > { %v1533_v36 = vpop.f32.mrb[5].mxu1  ;;  %v611_v37 = vsel %vm610_vm4, %v604_v35, -inf }
 0x24d   : > { %612 = vmax.xlane.f32.xlu1 %v611_v37  ;;  %v607_v38 = vpop.f32.mrb[6].mxu1 }
 0x24e   : > { %v1534_v39 = vpop.f32.mrb[7].mxu1 }
 0x24f   : > { %v1671_v39 = vld [vmem:[%s2247_s3] sm:$0xff]  }
 0x250   : > { %1578 = vmatpush3.bf16.msra.mxu1 %v1671_v39 }
 0x251   : > { %1579 = vmatprep.subr.bf16.mxu1 %v1798_v7 }
 0x253   : > { %v714_v40 = vpop.f32.mrb[8].mxu1 }
 0x254   : > { %v1545_v41 = vpop.f32.mrb[9].mxu1  ;;  %v720_v42 = vsel %vm610_vm4, %v714_v40, -inf }
 0x255   : > { %721 = vmax.xlane.f32.xlu0 %v720_v42  ;;  %v717_v43 = vpop.f32.mrb[10].mxu1 }
 0x256   : > { %v1546_v44 = vpop.f32.mrb[11].mxu1 }
 0x257   : > { %v1673_v44 = vld [vmem:[%s2247_s3 + $0x10] sm:$0xff]  }
 0x25b   : > { %v825_v45 = vpop.f32.mrb[12].mxu1 }
 0x25c   : > { %v1557_v46 = vpop.f32.mrb[13].mxu1  ;;  %v831_v47 = vsel %vm610_vm4, %v825_v45, -inf }
 0x25d   : > { %832 = vmax.xlane.f32.xlu0 %v831_v47  ;;  %v828_v48 = vpop.f32.mrb[14].mxu1 }
 0x25e   : > { %v1558_v49 = vpop.f32.mrb[15].mxu1 }
 0x263   : > { %v935_v50 = vpop.f32.mrb[16].mxu1 }
 0x264   : > { %v1569_v51 = vpop.f32.mrb[17].mxu1  ;;  %v941_v52 = vsel %vm610_vm4, %v935_v50, -inf }
 0x265   : > { %942 = vmax.xlane.f32.xlu1 %v941_v52  ;;  %v938_v53 = vpop.f32.mrb[18].mxu1 }
 0x266   : > { %v1570_v54 = vpop.f32.mrb[19].mxu1 }
 0x2da   : > { %v613_v55 = vpop.xlane.xlu1 %612 }
 0x2db   : > { %v614_v56 = vsub.f32 %v604_v35, %v613_v55 }
 0x2dd   : > { %v615_v57 = vmul.f32 1.442695, %v614_v56 }
 0x2df   : > { %1681 = vpow2.f32 %v615_v57 }
 0x2e2   : > { %v722_v58 = vpop.xlane.xlu0 %721 }
 0x2e3   : > { %v723_v59 = vsub.f32 %v714_v40, %v722_v58  ;;  %v1672_v40 = vld [vmem:[%s2247_s3 + $0x8] sm:$0xff]  }
 0x2e4   : > { %1580 = vmatpush3.bf16.msra.mxu1 %v1672_v40 }
 0x2e5   : > { %v724_v60 = vmul.f32 1.442695, %v723_v59  ;;  %1581 = vmatprep.subr.bf16.mxu1 %v1798_v7 }
 0x2e7   : > { %1683 = vpow2.f32 %v724_v60 }
 0x2e8   : > { %1582 = vmatpush3.bf16.msra.mxu1 %v1673_v44 }
 0x2e9   : > { %v1682_v61 = vpop.eup %1681  ;;  %1583 = vmatprep.subr.bf16.mxu1 %v1798_v7 }
 0x2ea   : > { %v833_v62 = vpop.xlane.xlu0 %832  ;;  %v617_v63 = vsel %vm610_vm4, %v1682_v61, 0.0 }
 0x2eb   : > { %v834_v0 = vsub.f32 %v825_v45, %v833_v62  ;;  %618 = vadd.xlane.f32.xlu0 %v617_v63  ;;  %v1474_v62 = vld [vmem:[%s2219_s4] ss:$0 sm:$0xff] }
 0x2ed   : > { %v835_v1 = vmul.f32 1.442695, %v834_v0 }
 0x2ef   : > { %1685 = vpow2.f32 %v835_v1 }
 0x2f1   : > { %v1684_v2 = vpop.eup %1683 }
 0x2f2   : > { %v726_v3 = vsel %vm610_vm4, %v1684_v2, 0.0  ;;  %v943_v8 = vpop.xlane.xlu1 %942 }
 0x2f3   : > { %727 = vadd.xlane.f32.xlu1 %v726_v3  ;;  %v944_v9 = vsub.f32 %v935_v50, %v943_v8  ;;  %v1674_v50 = vld [vmem:[%s2247_s3 + $0x18] sm:$0xff]  }
 0x2f4   : > { %1584 = vmatpush3.bf16.msra.mxu1 %v1674_v50 }
 0x2f5   : > { %v945_v10 = vmul.f32 1.442695, %v944_v9 }
 0x2f7   : > { %1687 = vpow2.f32 %v945_v10 }
 0x2f9   : > { %v1686_v4 = vpop.eup %1685 }
 0x2fa   : > { %v837_v6 = vsel %vm610_vm4, %v1686_v4, 0.0 }
 0x2fb   : > { %838 = vadd.xlane.f32.xlu0 %v837_v6 }
 0x301   : > { %v1688_v11 = vpop.eup %1687 }
 0x302   : > { %v947_v12 = vsel %vm610_vm4, %v1688_v11, 0.0 }
 0x304   : > { %843 = vrot.lane.b32.xlu1 %v1965_v22, %s1805_s25 }
 0x311   : > { %733 = vrot.lane.b32.xlu0 %v1965_v22, %s1800_s22  ;;  %s2117_s22 = sand.u32 1, %s1787_s30  }
 0x312   : > { %s2233_s28 = sshll.u32 %s2117_s22, 3 }
 0x313   : > { %s469_s25 = scalar_lea.vmem [#allocation4], %s2233_s28  ;;  %s1809_s28 = smov [#allocation4]  }
 0x314   : > { %s1705_s0 = sshll.u32 %s1809_s28, 4  ;;  %s1706_s0 = int_to_ptr.vmem [resolvable:$false] %s1705_s0 }
 0x315   : > { %s1707_s27 = scalar_lea.vmem %s1706_s0, 256 }
 0x328   : > { %948 = vadd.xlane.f32.xlu1 %v947_v12 }
 0x339   : > { %953 = vrot.lane.b32.xlu1 %v1965_v22, %s1806_s26  ;;  %s1363_s26 = sshll.u32 %s469_s25, 4  ;;  %s2133_s26 = int_to_ptr.vmem [resolvable:$true] %s1363_s26 }
 0x33a   : > { %p1708_p0 = scmp.lt.s32.totalorder %s2133_s26, %s1706_s0 }
 0x378   : > { %v619_v13 = vpop.xlane.xlu0 %618 }
 0x379   : > { %1689 = vrcp.f32 %v619_v13  ;;  %v1675_v13 = vld [vmem:[%s2222_s7] sm:$0xff]  }
 0x380   : > { %v728_v14 = vpop.xlane.xlu1 %727 }
 0x381   : > { %1691 = vrcp.f32 %v728_v14 }
 0x383   : > { %v1690_v15 = vpop.eup %1689 }
 0x384   : > { %v2010_v16 = vmul.f32 %v1690_v15, %v1682_v61  ;;  %v844_v23 = vpop.permute.xlu1 %843 }
 0x385   : > { %v849_v25 = vsel %vm626_vm2, %v844_v23, 0 }
 0x386   : > { %v622_v17 = vpack.c.bf16 %v2010_v16, %v2010_v16 }
 0x388   : > { %1538 = vmatmul.mubr.msk.bf16.vlgmr.msra.gmra.mrb[0].mxu0 %vm610_vm4, %v622_v17  ;;  %v839_v18 = vpop.xlane.xlu0 %838 }
 0x389   : > { %1693 = vrcp.f32 %v839_v18  ;;  %1549 = vmatprep.mubr.msk.bf16.mxu0 %vm1799_vm1, %v1798_v7 }
 0x38b   : > { %v1692_v19 = vpop.eup %1691 }
 0x38c   : > { %v2017_v20 = vmul.f32 %v1692_v19, %v1684_v2  ;;  %v734_v21 = vpop.permute.xlu0 %733  ;;  %v1480_v19 = vld [vmem:[%s2220_s5] ss:$0 sm:$0xff] }
 0x38d   : > { %v739_v22 = vsel %vm626_vm2, %v734_v21, 0 }
 0x38e   : > { %1548 = vmatpush3.bf16.msra.mxu0 %v739_v22  ;;  %v731_v24 = vpack.c.bf16 %v2017_v20, %v2017_v20  ;;  %v1481_v22 = vld [vmem:[%s2221_s6] ss:$0 sm:$0xff] }
 0x38f   : > { %1559 = vmatprep.subr.bf16.mxu0 %v1798_v7 }
 0x391   : > { %1550 = vmatmul.mubr.msk.bf16.vlgmr.msra.gmra.mrb[4].mxu0 %vm610_vm4, %v731_v24 }
 0x392   : > { %1560 = vmatpush3.bf16.msra.mxu0 %v849_v25  ;;  %1561 = vmatprep.mubr.msk.bf16.mxu0 %vm1799_vm1, %v1798_v7  ;;  %v1677_v25 = vld [vmem:[%s2224_s9] sm:$0xff]  }
 0x393   : > { %v1694_v26 = vpop.eup %1693  ;;  %1571 = vmatprep.subr.bf16.mxu0 %v1798_v7 }
 0x394   : > { %v2028_v27 = vmul.f32 %v1694_v26, %v1686_v4 }
 0x396   : > { %v842_v28 = vpack.c.bf16 %v2028_v27, %v2028_v27 }
 0x399   : > { %1562 = vmatmul.mubr.msk.bf16.vlgmr.msra.gmra.mrb[8].mxu0 %vm610_vm4, %v842_v28  ;;  %v1679_v28 = vld [vmem:[%s2224_s9 + $0x10] sm:$0xff]  }
 0x39a   : > { %1573 = vmatprep.mubr.msk.bf16.mxu0 %vm1799_vm1, %v1798_v7 }
 0x3b5   : > { %v949_v29 = vpop.xlane.xlu1 %948 }
 0x3b6   : > { %1695 = vrcp.f32 %v949_v29  ;;  %v1680_v29 = vld [vmem:[%s2224_s9 + $0x18] sm:$0xff]  }
 0x3b9   : > { %v954_v30 = vpop.permute.xlu1 %953 }
 0x3ba   : > { %v959_v31 = vsel %vm626_vm2, %v954_v30, 0  ;;  %v1482_v30 = vld [vmem:[%s2223_s8] ss:$0 sm:$0xff] }
 0x3bb   : > { %1572 = vmatpush3.bf16.msra.mxu0 %v959_v31 }
 0x3bc   : > { %1589 = vmatprep.subr.bf16.mxu0 %v1798_v7 }
 0x3c0   : > { %v1696_v32 = vpop.eup %1695 }
 0x3c1   : > { %v2037_v33 = vmul.f32 %v1696_v32, %v1688_v11 }
 0x3c3   : > { %v952_v34 = vpack.c.bf16 %v2037_v33, %v2037_v33 }
 0x3c5   : > { %1574 = vmatmul.mubr.msk.bf16.vlgmr.msra.gmra.mrb[12].mxu0 %vm610_vm4, %v952_v34 }
 0x3c6   : > { %1593 = vmatprep.mubr.msk.bf16.mxu0 %vm1799_vm1, %v1798_v7  ;;  %1590 = vmatpush3.bf16.msra.mxu0 %v1675_v13 }
 0x3c7   : > { %1591 = vmatprep.subr.bf16.mxu0 %v1798_v7 }
 0x45b   : > { %v664_v35 = vpop.f32.mrb[0].mxu0 }
 0x45c   : > { %v1539_v36 = vpop.f32.mrb[1].mxu0 }
 0x45d   : > { %v667_v37 = vpop.f32.mrb[2].mxu0 }
 0x45e   : > { %v1540_v38 = vpop.f32.mrb[3].mxu0 }
 0x464   : > { %v775_v41 = vpop.f32.mrb[4].mxu0 }
 0x465   : > { %1019 = vrot.lane.b32.xlu0 %v775_v41, %s1804_s21  ;;  %v1551_v42 = vpop.f32.mrb[5].mxu0 }
 0x466   : > { %v778_v43 = vpop.f32.mrb[6].mxu0 }
 0x467   : > { %v1552_v45 = vpop.f32.mrb[7].mxu0 }
 0x46c   : > { %v885_v46 = vpop.f32.mrb[8].mxu0 }
 0x46d   : > { %1023 = vrot.lane.b32.xlu1 %v885_v46, %s1802_s18  ;;  %v1563_v47 = vpop.f32.mrb[9].mxu0 }
 0x46e   : > { %v888_v48 = vpop.f32.mrb[10].mxu0 }
 0x46f   : > { %v1564_v49 = vpop.f32.mrb[11].mxu0 }
 0x498   : > { %v995_v51 = vpop.f32.mrb[12].mxu0 }
 0x499   : > { %1027 = vrot.lane.b32.xlu0 %v995_v51, %s1803_s20  ;;  %v1575_v52 = vpop.f32.mrb[13].mxu0  ;;  %s1807_s20 = smov 8  }
 0x49a   : > { %v998_v53 = vpop.f32.mrb[14].mxu0 }
 0x49b   : > { %v1576_v54 = vpop.f32.mrb[15].mxu0 }
 0x4d7   : > { %v1020_v55 = vpop.permute.xlu0 %1019 }
 0x4d8   : > { %v1030_v57 = vsel %vm563_vm3, %v664_v35, %v1020_v55 }
 0x4df   : > { %v1024_v56 = vpop.permute.xlu1 %1023 }
 0x4e0   : > { %v1031_v58 = vsel %vm513_vm0, %v1030_v57, %v1024_v56 }
 0x50b   : > { %v1028_v59 = vpop.permute.xlu0 %1027 }
 0x50c   : > { %v1033_v60 = vsel %vm1032_vm5, %v1031_v58, %v1028_v59 }
 0x50d   : > { %v1034_v61 = vpack.c.bf16 %v1033_v60, %v1033_v60 }
 0x50f   : > { %1586 = vmatmul.mubr.msk.bf16.vlgmr.msra.gmra.mrb[20].mxu1 %vm1074_vm6, %v1034_v61 }
 0x5e2   : > { %v1112_v63 = vpop.f32.mrb[20].mxu1 }
 0x5e3   : > { %v1113_v0 = vadd.f32 %v1474_v62, %v1112_v63  ;;  %v1587_v1 = vpop.f32.mrb[21].mxu1 }
 0x5e4   : > { %v1115_v2 = vpop.f32.mrb[22].mxu1 }
 0x5e5   : > { %v1588_v3 = vpop.f32.mrb[23].mxu1  ;;  %v1118_v4 = vadd.f32 %v1113_v0, %v1951_v5  ;;  %v1676_v5 = vld [vmem:[%s2222_s7 + $0x8] sm:$0xff]  }
 0x5e6   : > { %1592 = vmatpush3.bf16.msra.mxu0 %v1676_v5 }
 0x5e7   : > { %v1121_v6 = vsel %vm513_vm0, %v1118_v4, 0.0  ;;  %1597 = vmatprep.subr.bf16.mxu0 %v1798_v7 }
 0x5e8   : > { %1122 = vadd.xlane.f32.xlu1 %v1121_v6 }
 0x5f9   : > { %1006 = vrot.lane.b32.xlu1 %v2028_v27, %s1804_s21  ;;  %v1678_v27 = vld [vmem:[%s2224_s9 + $0x8] sm:$0xff]   ;;  %s2234_s21 = sshll.u32 %s1907_s17, 7 }
 0x5fa   : > { %s2131_s15 = scalar_lea.hbm %s2229_s14, %s2234_s21 }
 0x675   : > { %v1123_v8 = vpop.xlane.xlu1 %1122 }
 0x676   : > { %v1125_v9 = vmul.f32 0.03125, %v1123_v8 }
 0x678   : > { %v1126_v10 = vsub.f32 %v1118_v4, %v1125_v9 }
 0x679   : > { %v1007_v51 = vpop.permute.xlu1 %1006 }
 0x67a   : > { %v1127_v11 = vmul.f32 %v1126_v10, %v1126_v10 }
 0x67c   : > { %v1128_v12 = vsel %vm513_vm0, %v1127_v11, 0.0 }
 0x67d   : > { %1129 = vadd.xlane.f32.xlu0 %v1128_v12 }
 0x70a   : > { %v1130_v14 = vpop.xlane.xlu0 %1129 }
 0x70b   : > { %v1131_v15 = vmul.f32 0.03125, %v1130_v14 }
 0x70d   : > { %v1132_v17 = vadd.f32 1e-05, %v1131_v15 }
 0x70f   : > { %1697 = vrsqrt.f32 %v1132_v17 }
 0x719   : > { %v1698_v18 = vpop.eup %1697 }
 0x71a   : > { %v1134_v21 = vmul.f32 %v1698_v18, %v1126_v10 }
 0x71c   : > { %v1141_v23 = vmul.f32 %v1480_v19, %v1134_v21 }
 0x71e   : > { %v1148_v24 = vadd.f32 %v1481_v22, %v1141_v23 }
 0x720   : > { %v1149_v26 = vpack.c.bf16 %v1148_v24, %v1148_v24 }
 0x722   : > { %1594 = vmatmul.mubr.msk.bf16.vlgmr.msra.gmra.mrb[16].mxu0 %vm513_vm0, %v1149_v26 }
 0x723   : > { %1598 = vmatpush3.bf16.msra.mxu0 %v1677_v25  ;;  %1605 = vmatprep.mubr.msk.bf16.mxu0 %vm1799_vm1, %v1798_v7 }
 0x724   : > { %1599 = vmatprep.subr.bf16.mxu0 %v1798_v7 }
 0x727   : > { %1600 = vmatpush3.bf16.msra.mxu0 %v1678_v27 }
 0x728   : > { %1601 = vmatprep.subr.bf16.mxu0 %v1798_v7 }
 0x72b   : > { %1602 = vmatpush3.bf16.msra.mxu0 %v1679_v28 }
 0x72c   : > { %1603 = vmatprep.subr.bf16.mxu0 %v1798_v7  ;;  %v1486_v7 = vld [vmem:[%s2225_s10] ss:$0 sm:$0xff] }
 0x72f   : > { %1604 = vmatpush3.bf16.msra.mxu0 %v1680_v29 }
 0x7f5   : > { %v1210_v31 = vpop.f32.mrb[16].mxu0 }
 0x7f6   : > { %v1211_v32 = vadd.f32 %v1482_v30, %v1210_v31  ;;  %v1595_v34 = vpop.f32.mrb[17].mxu0 }
 0x7f7   : > { %v1213_v35 = vpop.f32.mrb[18].mxu0 }
 0x7f8   : > { %v1216_v36 = vmax.f32 %v1211_v32, 0.0  ;;  %v1596_v37 = vpop.f32.mrb[19].mxu0 }
 0x7fa   : > { %v1217_v38 = vpack.c.bf16 %v1216_v36, %v1216_v36 }
 0x7fc   : > { %1606 = vmatmul.mubr.msk.bf16.vlgmr.msra.gmra.mrb[20].mxu0 %vm1074_vm6, %v1217_v38 }
 0x8cf   : > { %v1294_v39 = vpop.f32.mrb[20].mxu0 }
 0x8d0   : > { %v1295_v40 = vadd.f32 %v1486_v7, %v1294_v39  ;;  %v1607_v41 = vpop.f32.mrb[21].mxu0 }
 0x8d1   : > { %v1297_v42 = vpop.f32.mrb[22].mxu0 }
 0x8d2   : > { %v1608_v43 = vpop.f32.mrb[23].mxu0  ;;  %v1300_v44 = vadd.f32 %v1295_v40, %v1148_v24 }
 0x8d4   : > { %v1303_v45 = vsel %vm513_vm0, %v1300_v44, 0.0 }
 0x8d5   : > { %1304 = vadd.xlane.f32.xlu0 %v1303_v45 }
 0x8eb   : > { %1002 = vrot.lane.b32.xlu0 %v2017_v20, %s1807_s20  ;;  %s1337_s20 = scalar_lea.sflag [#allocation5], %s2117_s22 }
 0x962   : > { %v1305_v46 = vpop.xlane.xlu0 %1304 }
 0x963   : > { %v1306_v47 = vmul.f32 0.03125, %v1305_v46 }
 0x965   : > { %v1307_v48 = vsub.f32 %v1300_v44, %v1306_v47 }
 0x966   : > { %v1003_v52 = vpop.permute.xlu0 %1002 }
 0x967   : > { %v1308_v49 = vmul.f32 %v1307_v48, %v1307_v48  ;;  %v1013_v53 = vsel %vm610_vm4, %v2010_v16, %v1003_v52 }
 0x968   : > { %v1014_v56 = vsel %vm563_vm3, %v1013_v53, %v1007_v51 }
 0x969   : > { %v1309_v50 = vsel %vm513_vm0, %v1308_v49, 0.0 }
 0x96a   : > { %1310 = vadd.xlane.f32.xlu1 %v1309_v50 }
 0x97b   : > { %1010 = vrot.lane.b32.xlu1 %v2037_v33, %s1808_s19  ;;  %s1701_s19 = scalar_lea.vmem %s2133_s26, 128 }
 0x97c   : > { %p1702_p11 = scmp.ne.s32.totalorder %s2133_s26, %s1701_s19  ;;  %p1709_p1 = scmp.lt.s32.totalorder %s1707_s27, %s1701_s19 }
 0x97e   : > { %p1703_p12 = pnand %p1702_p11, %p1924_p5  ;;  %p1710_p2 = por %p1709_p1, %p1708_p0 }
 0x980   : > { %p1704_p13 = pneg %p1703_p12 }
 0x982   : > { %p1711_p3 = pnand %p1710_p2, %p1704_p13 }
 0x9f7   : > { %v1311_v20 = vpop.xlane.xlu1 %1310 }
 0x9f8   : > { %v1312_v54 = vmul.f32 0.03125, %v1311_v20 }
 0x9fa   : > { %v1313_v33 = vadd.f32 1e-05, %v1312_v54 }
 0x9fb   : > { %v1011_v55 = vpop.permute.xlu1 %1010 }
 0x9fc   : > { %1699 = vrsqrt.f32 %v1313_v33  ;;  %v1016_v16 = vsel %vm1015_vm7, %v1014_v56, %v1011_v55 }
 0x9fd   : > { %1017 = vst.msk [vmem:[%s469_s25] sm:$0xff] %vm513_vm0, %v1016_v16 }
 0x9fe   : > { %1714 = shalt.err (!%p1711_p3)
}
 0x9ff   : > { %s1715_s25 = scalar_lea.hbm %s2131_s15, 128  ;;  %s1719_s28 = scalar_lea.hbm %s2229_s14, 256 }
 0xa00   : > { %p1716_p4 = scmp.ne.s32.totalorder %s2131_s15, %s1715_s25  ;;  %p1720_p9 = scmp.lt.u32.totalorder %s2131_s15, %s2229_s14 }
 0xa01   : > { %p1721_p10 = scmp.lt.u32.totalorder %s1719_s28, %s1715_s25  ;;  %p1723_p12 = scmp.lt.u32.totalorder %s1715_s25, %s2131_s15 }
 0xa02   : > { %p1717_p7 = pnand %p1716_p4, %p1924_p5 }
 0xa03   : > { %p1722_p11 = por %p1721_p10, %p1720_p9 }
 0xa04   : > { %p1718_p8 = pneg %p1717_p7 }
 0xa05   : > { %p1724_p13 = por %p1723_p12, %p1722_p11 }
 0xa07   : > { %p1725_p0 = pnand %p1724_p13, %p1718_p8 }
 0xa09   : > { %1728 = shalt.err (!%p1725_p0)
}
 0xa0a   : > { %1610 = dma.vmem_to_hbm [thread:$0]  (%p1924_p5), %s2133_s26, 128, %s2131_s15, %s1337_s20   ;;  %v1700_v57 = vpop.eup %1699  ;;  %v1492_v58 = vld [vmem:[%s2226_s11] ss:$0 sm:$0xff] }
 0xa0b   : > { %v1315_v59 = vmul.f32 %v1700_v57, %v1307_v48  ;;  %v1493_v60 = vld [vmem:[%s2227_s12] ss:$0 sm:$0xff]  ;;  %s2248_s25 = sshll.u32 %s2117_s22, 3  ;;  %s2249_s0 = sshll.u32 %s1907_s17, 7 }
 0xa0c   : > { %s462_s18 = scalar_lea.vmem [#allocation2], %s2248_s25  ;;  %s2171_s26 = scalar_lea.hbm %s2228_s13, %s2249_s0 }
 0xa0d   : > { %s1350_s28 = sshll.u32 %s462_s18, 4  ;;  %v1322_v61 = vmul.f32 %v1492_v58, %v1315_v59  ;;  %s1332_s15 = scalar_lea.sflag [#allocation3], %s2117_s22  ;;  %s2173_s28 = int_to_ptr.vmem [resolvable:$true] %s1350_s28 }
 0xa0e   : > { %s1729_s20 = scalar_lea.vmem %s2173_s28, 128  ;;  %s1810_s21 = smov [#allocation2]  }
 0xa0f   : > { %v1329_v62 = vadd.f32 %v1493_v60, %v1322_v61  ;;  %p1730_p1 = scmp.ne.s32.totalorder %s2173_s28, %s1729_s20  ;;  %s1733_s17 = sshll.u32 %s1810_s21, 4  ;;  %s1734_s17 = int_to_ptr.vmem [resolvable:$false] %s1733_s17 }
 0xa10   : > { %s1735_s19 = scalar_lea.vmem %s1734_s17, 256  ;;  %p1736_p4 = scmp.lt.s32.totalorder %s2173_s28, %s1734_s17 }
 0xa11   : > { %1330 = vst.msk [vmem:[%s462_s18] sm:$0xff] %vm513_vm0, %v1329_v62  ;;  %p1731_p2 = pnand %p1730_p1, %p1924_p5  ;;  %p1737_p7 = scmp.lt.s32.totalorder %s1735_s19, %s1729_s20 }
 0xa13   : > { %p1732_p3 = pneg %p1731_p2  ;;  %p1738_p8 = por %p1737_p7, %p1736_p4 }
 0xa15   : > { %p1739_p9 = pnand %p1738_p8, %p1732_p3 }
 0xa17   : > { %1742 = shalt.err (!%p1739_p9)
}
 0xa18   : > { %s1743_s2 = scalar_lea.hbm %s2171_s26, 128  ;;  %s1747_s1 = scalar_lea.hbm %s2228_s13, 256 }
 0xa19   : > { %p1744_p10 = scmp.ne.s32.totalorder %s2171_s26, %s1743_s2  ;;  %p1748_p13 = scmp.lt.u32.totalorder %s2171_s26, %s2228_s13 }
 0xa1a   : > { %p1749_p0 = scmp.lt.u32.totalorder %s1747_s1, %s1743_s2  ;;  %p1751_p2 = scmp.lt.u32.totalorder %s1743_s2, %s2171_s26 }
 0xa1b   : > { %p1745_p11 = pnand %p1744_p10, %p1924_p5 }
 0xa1c   : > { %p1750_p1 = por %p1749_p0, %p1748_p13 }
 0xa1d   : > { %p1746_p12 = pneg %p1745_p11 }
 0xa1e   : > { %p1752_p3 = por %p1751_p2, %p1750_p1 }
 0xa20   : > { %p1753_p4 = pnand %p1752_p3, %p1746_p12 }
 0xa22   : > { %1756 = shalt.err (!%p1753_p4)
}
 0xa23   : > { %1609 = dma.vmem_to_hbm [thread:$0]  (%p1924_p5), %s2173_s28, 128, %s2171_s26, %s1332_s15  }
 0xa24 PF: > { %p1620_p7 = scmp.ge.s32.totalorder %s1795_s16, 2  ;;  %s1375_s18 = sand.u32 1, %s1783_s29  }
 0xa25   : > { %s1376_s0 = scalar_lea.sflag [#allocation3], %s1375_s18 }
 0xa26   : > { %p1614_p8 = pnand %p1620_p7, %p1928_p6 }
 0xa28   : > { %1774 = dma.done.wait (!%p1614_p8), %s1376_s0, 128  }
 0xa29   : > { %1776 = vsyncadd (!%p1614_p8), %s1376_s0, 4294967168  ;;  %s1385_s20 = scalar_lea.sflag [#allocation5], %s1375_s18 }
 0xa2a   : > { %1778 = dma.done.wait (!%p1614_p8), %s1385_s20, 128  }
 0xa2b   : > { %1780 = vsyncadd (!%p1614_p8), %s1385_s20, 4294967168  ;;  %s2250_s16 = sld [smem:[#allocation9_spill]]  ;;  %s2251_s23 = sld [smem:[#allocation8_spill]] }
 0xa2c   : > { %s2252_s15 = sld [smem:[#allocation10_spill]]  ;;  %s2253_s29 = smov %s1787_s30 }
 0xa31   : > { %p28_p5 = scmp.ge.s32.totalorder %s2250_s16, 4   ;;  %s2254_s30 = smov %s2251_s23 }
 0xa33   :  { %30 = sbr.rel (!%p28_p5) target bundleno = 10 (0xa), region = 124 }
 0xa3a   :  { %1390 = vsyncpa [#allocation3], 1 }
 0xa3b   :  { %1392 = vsyncpa [#allocation3 + $0x1], 1 }
 0xa3c   :  { %1393 = vsyncpa [#allocation5], 1 }
 0xa3d   :  { %1395 = vsyncpa [#allocation5 + $0x1], 1 }

</bundles_post_ra>
